<compile_context>
chip_gen: v6e
topology: v6e:2x2x1
jax: 0.10.0
libtpu: 0.0.40
codegen_flags: <defaults>
</compile_context>

<pallas_src>
from functools import partial

import numpy as np
import jax
import jax.numpy as jnp
from jax import lax
from jax.experimental import pallas as pl
from jax.experimental.pallas import tpu as pltpu


def _round_up(x, m):
    return ((x + m - 1) // m) * m


def _cosine_embedding_kernel(taus_ref, repl_ref, ipi_ref, w_ref, b_ref, o_ref,
                             *, matmul_precision):
    # taus_ref : (TM, Pk)        packed taus (P consecutive real rows per packed row)
    # repl_ref : (Pk, P*C)       0/1 replication matrix: repl[j, j*C + c] = 1
    # ipi_ref  : (1,  P*C)       lane-tiled pi * [1..C]
    # w_ref    : (P*C, P*Ep)     block-diagonal weight kron(eye(P), W^T padded)
    # b_ref    : (1,  P*Ep)      lane-tiled (padded) bias
    # o_ref    : (TM, P*Ep)      packed output, 128-lane-dense unmasked stores
    t = taus_ref[...]                                     # (TM, Pk)

    # Exact lane replication on the MXU (0/1 matrix at HIGHEST precision keeps
    # the f32 taus bit-exact); MXU has plenty of slack here.
    t_rep = jnp.dot(t, repl_ref[...],
                    preferred_element_type=jnp.float32,
                    precision=lax.Precision.HIGHEST)      # (TM, P*C)

    x = t_rep * ipi_ref[...]                              # single full-lane VPU mul
    cosv = jnp.cos(x)                                     # EUP, full 128-lane occupancy

    acc = jnp.dot(cosv, w_ref[...],
                  preferred_element_type=jnp.float32,
                  precision=matmul_precision)             # (TM, P*Ep) on MXU
    acc = acc + b_ref[...]
    o_ref[...] = jnp.maximum(acc, 0.0).astype(o_ref.dtype)


@partial(jax.jit,
         static_argnames=("num_cosines", "embedding_dim", "matmul_precision"))
def cosine_embedding_forward(taus, weight, bias, num_cosines, embedding_dim,
                             matmul_precision=lax.Precision.HIGHEST):
    """taus: (B, N) float32.  weight: (E, C) (PyTorch layout).  bias: (E,)."""
    B, N = taus.shape
    M = B * N
    C = num_cosines
    E = embedding_dim

    # ---- lane packing: make the packed output row exactly a multiple of 128 ----
    if E <= 128:
        E_pad = pl.next_power_of_2(E)        # power of two -> divides 128
        P = 128 // E_pad
    else:
        E_pad = _round_up(E, 128)
        P = 1
    P_k = _round_up(P, 8)                    # contraction dim of replication matmul

    # ---- row tiling: big (~1 MiB) output blocks, but >= 2 grid steps when possible ----
    Mp = -(-M // P)                          # packed rows
    TM_TARGET = 2048                         # packed rows per grid step
    if Mp > 8:
        n_steps = max(2, -(-Mp // TM_TARGET))            # >= 2 steps for v7x megacore
        TM = min(TM_TARGET, _round_up(-(-Mp // n_steps), 8))
    else:
        TM = 8
    Mp_pad = _round_up(Mp, TM)
    M_pad = Mp_pad * P

    # ---- pack + pad taus: packed row r holds real rows r*P .. r*P+P-1 ----
    taus_flat = taus.reshape(M).astype(jnp.float32)
    taus_flat = jnp.pad(taus_flat, (0, M_pad - M))
    taus_packed = taus_flat.reshape(Mp_pad, P)
    if P_k > P:
        taus_packed = jnp.pad(taus_packed, ((0, 0), (0, P_k - P)))

    # ---- grid-constant operands (built once at trace time) ----
    # 0/1 replication matrix: repl[j, j*C + c] = 1.
    repl = jnp.kron(jnp.eye(P, dtype=jnp.float32),
                    jnp.ones((1, C), dtype=jnp.float32))             # (P, P*C)
    if P_k > P:
        repl = jnp.pad(repl, ((0, P_k - P), (0, 0)))                 # (Pk, P*C)

    i_pi = np.pi * jnp.arange(1, C + 1, dtype=jnp.float32)           # (C,)
    ipi_tiled = jnp.tile(i_pi, (P,)).reshape(1, P * C)               # (1, P*C)

    w_t = weight.astype(jnp.float32).T                               # (C, E)
    w_t = jnp.pad(w_t, ((0, 0), (0, E_pad - E)))                     # (C, Ep)
    w_bd = jnp.kron(jnp.eye(P, dtype=jnp.float32), w_t)              # (P*C, P*Ep)
    b_pad = jnp.pad(bias.astype(jnp.float32), (0, E_pad - E))        # (Ep,)
    b_tiled = jnp.tile(b_pad.reshape(1, E_pad), (1, P))              # (1, P*Ep)

    grid = (Mp_pad // TM,)
    out_packed = pl.pallas_call(
        partial(_cosine_embedding_kernel, matmul_precision=matmul_precision),
        out_shape=jax.ShapeDtypeStruct((Mp_pad, P * E_pad), jnp.float32),
        grid=grid,
        in_specs=[
            pl.BlockSpec((TM, P_k), lambda i: (i, 0)),               # tiled over rows
            pl.BlockSpec((P_k, P * C), lambda i: (0, 0)),            # constant block
            pl.BlockSpec((1, P * C), lambda i: (0, 0)),              # constant block
            pl.BlockSpec((P * C, P * E_pad), lambda i: (0, 0)),      # constant block
            pl.BlockSpec((1, P * E_pad), lambda i: (0, 0)),          # constant block
        ],
        out_specs=pl.BlockSpec((TM, P * E_pad), lambda i: (i, 0)),
        compiler_params=pltpu.CompilerParams(
            dimension_semantics=("parallel",),                       # megacore / v7x 2-TC
            vmem_limit_bytes=32 * 1024 * 1024,
        ),
    )(taus_packed, repl, ipi_tiled, w_bd, b_tiled)

    # Free row-major view back to (M, E); drop row + embedding padding.
    out_flat = out_packed.reshape(M_pad, E_pad)[:M, :E]
    return out_flat.reshape(B, N, E)


if __name__ == "__main__":
    # Small, module-consistent shapes.
    batch_size = 2
    N = 8                 # number of taus per batch element
    num_cosines = 64
    embedding_dim = 32

    key = jax.random.PRNGKey(0)
    k_tau, k_w, k_b = jax.random.split(key, 3)

    # taus in [0, 1], like IQN quantile fractions.
    taus = jax.random.uniform(k_tau, (batch_size, N), dtype=jnp.float32)

    # Deterministic Linear(num_cosines, embedding_dim) params
    # (PyTorch-style uniform(-1/sqrt(fan_in), 1/sqrt(fan_in)) bounds).
    bound = 1.0 / np.sqrt(num_cosines)
    weight = jax.random.uniform(
        k_w, (embedding_dim, num_cosines), minval=-bound, maxval=bound,
        dtype=jnp.float32
    )
    bias = jax.random.uniform(
        k_b, (embedding_dim,), minval=-bound, maxval=bound, dtype=jnp.float32
    )

    out = cosine_embedding_forward(taus, weight, bias, num_cosines, embedding_dim)
    out = jax.block_until_ready(out)

    # Pure-JAX f32 reference (matmul at HIGHEST precision, matching the
    # kernel's default f32 nn.Linear semantics).
    i_pi = np.pi * jnp.arange(1, num_cosines + 1, dtype=jnp.float32).reshape(1, 1, -1)
    cos_ref = jnp.cos(taus[:, :, None] * i_pi).reshape(batch_size * N, num_cosines)
    lin_ref = jnp.dot(cos_ref, weight.T, precision=lax.Precision.HIGHEST) + bias
    ref = jnp.maximum(lin_ref, 0.0).reshape(batch_size, N, embedding_dim)
    np.testing.assert_allclose(np.asarray(out), np.asarray(ref), rtol=1e-5, atol=2e-5)

    # Reduced-precision fast path from the perf review (single-pass bf16 MXU
    # matmul, keeps v5e mem-bound) — looser tolerance by construction.
    out_fast = cosine_embedding_forward(
        taus, weight, bias, num_cosines, embedding_dim,
        matmul_precision=lax.Precision.DEFAULT)
    out_fast = jax.block_until_ready(out_fast)
    np.testing.assert_allclose(np.asarray(out_fast), np.asarray(ref),
                               rtol=1e-2, atol=1e-2)

    assert out.shape == (batch_size, N, embedding_dim)
    print("KERNEL_OK")
</pallas_src>

<mosaic_0001>
module attributes {stable_mosaic.version = 11 : i64} {
  func.func @_cosine_embedding_kernel(%arg0: i32, %arg1: memref<8x8xf32, #tpu.memory_space<vmem>>, %arg2: memref<8x256xf32, #tpu.memory_space<vmem>>, %arg3: memref<1x256xf32, #tpu.memory_space<vmem>>, %arg4: memref<256x128xf32, #tpu.memory_space<vmem>>, %arg5: memref<1x128xf32, #tpu.memory_space<vmem>>, %arg6: memref<8x128xf32, #tpu.memory_space<vmem>>) attributes {dimension_semantics = [#tpu.dimension_semantics<parallel>], iteration_bounds = array<i64: 1>, scalar_prefetch = 0 : i64, scratch_operands = 0 : i64, tpu.core_type = #tpu.core_type<tc>, window_params = [{transform_indices = @transform_0, window_bounds = array<i64: 8, 8>}, {pipeline_mode = #tpu.pipeline_mode<synchronous>, transform_indices = @transform_1, window_bounds = array<i64: 8, 256>}, {pipeline_mode = #tpu.pipeline_mode<synchronous>, transform_indices = @transform_2, window_bounds = array<i64: 1, 256>}, {pipeline_mode = #tpu.pipeline_mode<synchronous>, transform_indices = @transform_3, window_bounds = array<i64: 256, 128>}, {pipeline_mode = #tpu.pipeline_mode<synchronous>, transform_indices = @transform_4, window_bounds = array<i64: 1, 128>}, {transform_indices = @transform_5, window_bounds = array<i64: 8, 128>}]} {
    %c0 = arith.constant 0 : index
    %c0_0 = arith.constant 0 : index
    %0 = vector.load %arg1[%c0, %c0_0] : memref<8x8xf32, #tpu.memory_space<vmem>>, vector<8x8xf32>
    %c0_1 = arith.constant 0 : index
    %c0_2 = arith.constant 0 : index
    %1 = vector.load %arg2[%c0_1, %c0_2] : memref<8x256xf32, #tpu.memory_space<vmem>>, vector<8x256xf32>
    %cst = arith.constant dense<0.000000e+00> : vector<8x256xf32>
    %2 = tpu.matmul %0, %1, %cst {dimension_numbers = #tpu.dot_dimension_numbers<[1], [0], [0], [1], [0, 0, 1, 1], [], []>, precision = #tpu.contract_precision<fp32>} : vector<8x8xf32>, vector<8x256xf32>, vector<8x256xf32> -> vector<8x256xf32>
    %c0_3 = arith.constant 0 : index
    %c0_4 = arith.constant 0 : index
    %3 = vector.load %arg3[%c0_3, %c0_4] : memref<1x256xf32, #tpu.memory_space<vmem>>, vector<1x256xf32>
    %4 = vector.broadcast %3 : vector<1x256xf32> to vector<8x256xf32>
    %5 = arith.mulf %2, %4 : vector<8x256xf32>
    %6 = math.cos %5 : vector<8x256xf32>
    %c0_5 = arith.constant 0 : index
    %c0_6 = arith.constant 0 : index
    %7 = vector.load %arg4[%c0_5, %c0_6] : memref<256x128xf32, #tpu.memory_space<vmem>>, vector<256x128xf32>
    %cst_7 = arith.constant dense<0.000000e+00> : vector<8x128xf32>
    %8 = tpu.matmul %6, %7, %cst_7 {dimension_numbers = #tpu.dot_dimension_numbers<[1], [0], [0], [1], [0, 0, 1, 1], [], []>, precision = #tpu.contract_precision<fp32>} : vector<8x256xf32>, vector<256x128xf32>, vector<8x128xf32> -> vector<8x128xf32>
    %c0_8 = arith.constant 0 : index
    %c0_9 = arith.constant 0 : index
    %9 = vector.load %arg5[%c0_8, %c0_9] : memref<1x128xf32, #tpu.memory_space<vmem>>, vector<1x128xf32>
    %10 = vector.broadcast %9 : vector<1x128xf32> to vector<8x128xf32>
    %11 = arith.addf %8, %10 : vector<8x128xf32>
    %cst_10 = arith.constant 0.000000e+00 : f32
    %12 = vector.broadcast %cst_10 : f32 to vector<8x128xf32>
    %13 = arith.maximumf %11, %12 : vector<8x128xf32>
    %c0_11 = arith.constant 0 : index
    %c0_12 = arith.constant 0 : index
    %14 = vector.load %arg6[%c0_11, %c0_12] : memref<8x128xf32, #tpu.memory_space<vmem>>, vector<8x128xf32>
    tpu.vector_store %arg6[%c0_11, %c0_12], %13 {strides = array<i32>} : memref<8x128xf32, #tpu.memory_space<vmem>>, vector<8x128xf32>,
    return
  }
  func.func @transform_0(%arg0: i32) -> (i32, i32) {
    %c0_i32 = arith.constant 0 : i32
    %c0_i32_0 = arith.constant 0 : i32
    return %arg0, %c0_i32 : i32, i32
  }
  func.func @transform_1(%arg0: i32) -> (i32, i32) {
    %c0_i32 = arith.constant 0 : i32
    %c0_i32_0 = arith.constant 0 : i32
    %c0_i32_1 = arith.constant 0 : i32
    return %c0_i32, %c0_i32_0 : i32, i32
  }
  func.func @transform_2(%arg0: i32) -> (i32, i32) {
    %c0_i32 = arith.constant 0 : i32
    %c0_i32_0 = arith.constant 0 : i32
    %c0_i32_1 = arith.constant 0 : i32
    return %c0_i32, %c0_i32_0 : i32, i32
  }
  func.func @transform_3(%arg0: i32) -> (i32, i32) {
    %c0_i32 = arith.constant 0 : i32
    %c0_i32_0 = arith.constant 0 : i32
    %c0_i32_1 = arith.constant 0 : i32
    return %c0_i32, %c0_i32_0 : i32, i32
  }
  func.func @transform_4(%arg0: i32) -> (i32, i32) {
    %c0_i32 = arith.constant 0 : i32
    %c0_i32_0 = arith.constant 0 : i32
    %c0_i32_1 = arith.constant 0 : i32
    return %c0_i32, %c0_i32_0 : i32, i32
  }
  func.func @transform_5(%arg0: i32) -> (i32, i32) {
    %c0_i32 = arith.constant 0 : i32
    %c0_i32_0 = arith.constant 0 : i32
    return %arg0, %c0_i32 : i32, i32
  }
}

</mosaic_0001>

<bundles_post_ra>
// kernel: tile.12
= control target key start
LH: loop header
LB: loop body
LE: loop exit
PB: predicated region body
PF: predicated region fallthrough
CT: control target
= control target key end

     0   :  { %s22_s0 = inlined_call_operand.vmem [shape: f32[64], index: 0, kind: input, shape index: {}]   ;;  %s23_s1 = inlined_call_operand.vmem [shape: f32[4,64], index: 1, kind: output, shape index: {}]  }
   0x1   :  { %v4_v0 = vld [vmem:[%s22_s0] ss:$0 sm:$0xff] }
   0x2   :  { %5 = vst [vmem:[%s23_s1] sm:$0xf] %v4_v0 }

// kernel: tile.13
= control target key start
LH: loop header
LB: loop body
LE: loop exit
PB: predicated region body
PF: predicated region fallthrough
CT: control target
= control target key end

     0   :  { %s7_s8 = smov 3  ;;  %vm9_vm0 = vcmask 523264   ;;  %s34_s9 = smov 64   ;;  %vm16_vm1 = vcmask 1048064   ;;  %s54_s0 = inlined_call_operand.vmem [shape: f32[4,64], index: 0, kind: input, shape index: {}]   ;;  %s55_s1 = inlined_call_operand.vmem [shape: f32[1,256], index: 1, kind: output, shape index: {}]  }
   0x1   :  { %v5_v0 = vld [vmem:[%s54_s0] sm:$0xf]  ;;  %s12_s0 = smov 3 }
   0x2   :  { %6 = vst [vmem:[#allocation1] sm:$0xf] %v5_v0 }
   0x9   :  { %v13_v1 = vld [vmem:[#allocation1 + $0x1] ss:$2 sm:%s12_s0]   ;;  %v8_v2 = vld [vmem:[#allocation1] ss:$2 sm:%s7_s8]  }
   0xa   :  { %14 = vrot.lane.b32.xlu0 %v13_v1, %s34_s9  ;;  %10 = vst.msk [vmem:[#allocation0] ss:$8 sm:$0x3] %vm9_vm0, %v8_v2  }
  0x7c   :  { %v15_v3 = vpop.permute.xlu0 %14  }
  0x7d   :  { %17 = vst.msk [vmem:[#allocation0] ss:$8 sm:$0x3] %vm16_vm1, %v15_v3  }
  0x84   :  { %v22_v4 = vld [vmem:[#allocation0] sm:$0x1]  ;;  %v27_v5 = vld [vmem:[#allocation0 + $0x8] sm:$0x1] }
  0x85   :  { %25 = vst [vmem:[%s55_s1] sm:$0x1] %v22_v4  ;;  %32 = vst [vmem:[%s55_s1 + $0x1] sm:$0x1] %v27_v5 }

// kernel: cosine_embedding_forward.1
= control target key start
LH: loop header
LB: loop body
LE: loop exit
PB: predicated region body
PF: predicated region fallthrough
CT: control target
= control target key end

     0   :  { %vm23_vm0 = vcmask 64512   ;;  %v1861_v2 = vmov 0.0   ;;  %s2590_s1 = inlined_call_operand.vmem [shape: f32[8,256], index: 1, kind: input, shape index: {}]   ;;  %s2591_s0 = inlined_call_operand.vmem [shape: f32[8,8], index: 0, kind: input, shape index: {}]   ;;  %s2592_s3 = inlined_call_operand.vmem [shape: f32[256,128], index: 3, kind: input, shape index: {}]   ;;  %s2593_s2 = inlined_call_operand.vmem [shape: f32[1,256], index: 2, kind: input, shape index: {}]   ;;  %s2594_s4 = inlined_call_operand.vmem [shape: f32[1,128], index: 4, kind: input, shape index: {}]   ;;  %s2595_s5 = inlined_call_operand.vmem [shape: f32[8,128], index: 5, kind: output, shape index: {}]  }
   0x1   :  { %v22_v0 = vld [vmem:[%s2590_s1 + $0x8] sm:$0xff]  ;;  %v21_v1 = vld [vmem:[%s2590_s1] sm:$0xff]  ;;  %93 = vmatprep.mubr.f32.mxu0 %v1861_v2  ;;  %179 = vmatprep.mubr.f32.mxu1 %v1861_v2  ;;  %v743_v20 = vld [vmem:[%s2592_s3 + $0xf8] sm:$0xff] }
   0x2   :  { %v20_v3 = vld [vmem:[%s2591_s0] sm:$0xff]  ;;  %v57_v4 = vand.u32 4294901760, %v22_v0  ;;  %v59_v5 = vand.u32 4294901760, %v21_v1  ;;  %v1910_v21 = vand.u32 4294901760, %v743_v20  ;;  %v727_v22 = vld [vmem:[%s2592_s3 + $0x78] sm:$0xff]  ;;  %v742_v24 = vld [vmem:[%s2592_s3 + $0xf0] sm:$0xff] }
   0x3   :  { %v25_v6 = vsel %vm23_vm0, %v20_v3, 0  ;;  %v1915_v23 = vand.u32 4294901760, %v727_v22  ;;  %v1923_v26 = vand.u32 4294901760, %v742_v24  ;;  %v726_v27 = vld [vmem:[%s2592_s3 + $0x70] sm:$0xff]  ;;  %v741_v30 = vld [vmem:[%s2592_s3 + $0xe8] sm:$0xff]  ;;  %v740_v38 = vld [vmem:[%s2592_s3 + $0xe0] sm:$0xff] }
   0x4   :  { %v94_v7 = vand.u32 4294901760, %v25_v6  ;;  %58 = vmatprep.subr.mxu0 %v57_v4  ;;  %v136_v8 = vsub.f32 %v22_v0, %v57_v4  ;;  %v142_v9 = vsub.f32 %v21_v1, %v59_v5  ;;  %2700 = vst [vmem:[#allocation2_spill] sm:$0xff] %v1910_v21  ;;  %v1921_v25 = vsub.f32 %v743_v20, %v1910_v21  ;;  %v725_v34 = vld [vmem:[%s2592_s3 + $0x68] sm:$0xff]  ;;  %v724_v43 = vld [vmem:[%s2592_s3 + $0x60] sm:$0xff]  ;;  %v739_v48 = vld [vmem:[%s2592_s3 + $0xd8] sm:$0xff] }
   0x5   :  { %60 = vmatpush1.msra.mxu0 %v59_v5  ;;  %v1930_v28 = vsub.f32 %v727_v22, %v1915_v23  ;;  %v1932_v29 = vand.u32 4294901760, %v726_v27  ;;  %v1940_v32 = vsub.f32 %v742_v24, %v1923_v26  ;;  %v1942_v33 = vand.u32 4294901760, %v741_v30  ;;  %v723_v53 = vld [vmem:[%s2592_s3 + $0x58] sm:$0xff]  ;;  %v738_v58 = vld [vmem:[%s2592_s3 + $0xd0] sm:$0xff] }
   0x6   :  { %v95_v10 = vsub.f32 %v25_v6, %v94_v7  ;;  %v137_v11 = vand.u32 4294901760, %v136_v8  ;;  %219 = vmatprep.subr.mxu0 %v136_v8  ;;  %v143_v12 = vand.u32 4294901760, %v142_v9  ;;  %2701 = vst [vmem:[#allocation3_spill] sm:$0xff] %v1921_v25  ;;  %v2615_v31 = vand.u32 4294901760, %v1921_v25  ;;  %v722_v63 = vld [vmem:[%s2592_s3 + $0x50] sm:$0xff] }
   0x7   :  { %v2614_v35 = vand.u32 4294901760, %v1930_v28  ;;  %v1950_v36 = vsub.f32 %v726_v27, %v1932_v29  ;;  %v1952_v37 = vand.u32 4294901760, %v725_v34  ;;  %v2612_v40 = vand.u32 4294901760, %v1940_v32 }
   0x8   :  { %v96_v13 = vand.u32 4294901760, %v95_v10  ;;  %v138_v14 = vsub.f32 %v136_v8, %v137_v11  ;;  %v144_v15 = vsub.f32 %v142_v9, %v143_v12  ;;  %v979_v39 = vsub.f32 %v1921_v25, %v2615_v31 }
   0x9   :  { %v1963_v41 = vsub.f32 %v741_v30, %v1942_v33  ;;  %v1965_v42 = vand.u32 4294901760, %v740_v38  ;;  %v867_v44 = vsub.f32 %v1930_v28, %v2614_v35  ;;  %v2611_v45 = vand.u32 4294901760, %v1950_v36 }
   0xa   :  { %v97_v16 = vsub.f32 %v95_v10, %v96_v13  ;;  %v139_v17 = vand.u32 4294901760, %v138_v14  ;;  %v145_v18 = vand.u32 4294901760, %v144_v15  ;;  %v1976_v46 = vsub.f32 %v725_v34, %v1952_v37  ;;  %v736_v14 = vld [vmem:[%s2592_s3 + $0xc0] sm:$0xff] }
   0xb   :  { %v1978_v47 = vand.u32 4294901760, %v724_v43  ;;  %v980_v49 = vand.u32 4294901760, %v979_v39  ;;  %v986_v50 = vsub.f32 %v1940_v32, %v2612_v40  ;;  %v2609_v51 = vand.u32 4294901760, %v1963_v41 }
   0xc   :  { %v98_v19 = vand.u32 4294901760, %v97_v16  ;;  %140 = vmatprep.subr.mxu1 %v139_v17  ;;  %v1989_v52 = vsub.f32 %v740_v38, %v1965_v42  ;;  %v868_v54 = vand.u32 4294901760, %v867_v44  ;;  %v874_v55 = vsub.f32 %v1950_v36, %v2611_v45 }
   0xd   :  { %146 = vmatpush1.msra.mxu1 %v145_v18  ;;  %v2608_v56 = vand.u32 4294901760, %v1976_v46  ;;  %v2000_v57 = vsub.f32 %v724_v43, %v1978_v47  ;;  %v987_v59 = vand.u32 4294901760, %v986_v50  ;;  %v993_v60 = vsub.f32 %v1963_v41, %v2609_v51  ;;  %v735_v50 = vld [vmem:[%s2592_s3 + $0xb8] sm:$0xff] }
   0xe   :  { %99 = vmatmul.mubr.f32.vlgmr.msra.gmra.mxu0 %v98_v19  ;;  %181 = vmatmul.mubr.f32.vlgmr.msra.gmra.mxu1 %v94_v7  ;;  %v2607_v61 = vand.u32 4294901760, %v1989_v52  ;;  %v2010_v62 = vand.u32 4294901760, %v739_v48  ;;  %v875_v0 = vand.u32 4294901760, %v874_v55  ;;  %v2019_v3 = vand.u32 4294901760, %v723_v53  ;;  %v720_v19 = vld [vmem:[%s2592_s3 + $0x40] sm:$0xff] }
   0xf   :  { %222 = vmatpush1.msra.mxu0 %v142_v9  ;;  %295 = vmatprep.subr.mxu1 %v57_v4  ;;  %v881_v1 = vsub.f32 %v1976_v46, %v2608_v56  ;;  %v2030_v8 = vand.u32 4294901760, %v738_v58  ;;  %v721_v9 = vld [vmem:[%s2592_s3 + $0x48] sm:$0xff]  ;;  %v2072_v39 = vand.u32 4294901760, %v736_v14 }
  0x10   :  { %255 = vmatprep.mubr.f32.mxu0 %v1861_v2  ;;  %297 = vmatpush1.msra.mxu1 %v59_v5  ;;  %v1000_v6 = vsub.f32 %v1989_v52, %v2607_v61  ;;  %v2062_v27 = vand.u32 4294901760, %v721_v9 }
  0x11   :  { %373 = vmatprep.subr.mxu0 %v137_v11  ;;  %330 = vmatprep.mubr.f32.mxu1 %v1861_v2  ;;  %v2050_v17 = vsub.f32 %v738_v58, %v2030_v8  ;;  %v2093_v58 = vsub.f32 %v736_v14, %v2072_v39 }
  0x12   :  { %258 = vmatmul.mubr.f32.vlgmr.msra.gmra.mxu0 %v95_v10  ;;  %334 = vmatmul.mubr.f32.vlgmr.msra.gmra.mxu1 %v96_v13  ;;  %v882_v10 = vand.u32 4294901760, %v881_v1  ;;  %v2042_v13 = vand.u32 4294901760, %v722_v63  ;;  %v1001_v15 = vand.u32 4294901760, %v1000_v6 }
  0x13   :  { %377 = vmatpush1.msra.mxu0 %v143_v12  ;;  %449 = vmatprep.subr.mxu1 %v57_v4  ;;  %v737_v4 = vld [vmem:[%s2592_s3 + $0xc8] sm:$0xff]  ;;  %v2040_v12 = vsub.f32 %v723_v53, %v2019_v3  ;;  %v2601_v34 = vand.u32 4294901760, %v2050_v17  ;;  %2705 = vst [vmem:[#allocation7_spill] sm:$0xff] %v2093_v58 }
  0x14   :  { %410 = vmatprep.mubr.f32.mxu0 %v1861_v2  ;;  %451 = vmatpush1.msra.mxu1 %v59_v5  ;;  %v994_v5 = vand.u32 4294901760, %v993_v60  ;;  %v2052_v18 = vand.u32 4294901760, %v737_v4  ;;  %v2060_v24 = vsub.f32 %v722_v63, %v2042_v13 }
  0x15   :  { %484 = vmatprep.mubr.f32.mxu1 %v1861_v2  ;;  %1628 = vmatprep.subr.mxu0 %v1910_v21  ;;  %v2605_v2 = vand.u32 4294901760, %v2000_v57  ;;  %v2602_v22 = vand.u32 4294901760, %v2040_v12 }
  0x16   :  { %412 = vmatmul.mubr.f32.vlgmr.msra.gmra.mxu0 %v94_v7  ;;  %486 = vmatmul.mubr.f32.vlgmr.msra.gmra.mxu1 %v94_v7  ;;  %v2028_v7 = vsub.f32 %v739_v48, %v2010_v62  ;;  %2702 = vst [vmem:[#allocation4_spill] sm:$0xff] %v2060_v24  ;;  %v2070_v38 = vsub.f32 %v737_v4, %v2052_v18  ;;  %v2599_v44 = vand.u32 4294901760, %v2060_v24  ;;  %v734_v4 = vld [vmem:[%s2592_s3 + $0xb0] sm:$0xff] }
  0x17   :  { %1629 = vmatpush3.msra.mxu0 %v1915_v23  ;;  %1663 = vmatprep.subr.mxu1 %v980_v49  ;;  %v888_v11 = vsub.f32 %v2000_v57, %v2605_v2  ;;  %v895_v43 = vsub.f32 %v2040_v12, %v2602_v22  ;;  %v2080_v48 = vsub.f32 %v721_v9, %v2062_v27  ;;  %v2082_v49 = vand.u32 4294901760, %v720_v19 }
  0x18   :  { %1630 = vmatprep.subr.mxu0 %v1923_v26  ;;  %1664 = vmatpush3.msra.mxu1 %v868_v54  ;;  %v2603_v16 = vand.u32 4294901760, %v2028_v7  ;;  %2703 = vst [vmem:[#allocation5_spill] sm:$0xff] %v2070_v38  ;;  %v1014_v54 = vsub.f32 %v2050_v17, %v2601_v34  ;;  %v2598_v55 = vand.u32 4294901760, %v2070_v38  ;;  %v902_v63 = vsub.f32 %v2060_v24, %v2599_v44 }
  0x19   :  { %1631 = vmatpush3.msra.mxu0 %v1932_v29  ;;  %1665 = vmatprep.subr.mxu1 %v987_v59  ;;  %v889_v20 = vand.u32 4294901760, %v888_v11  ;;  %2704 = vst [vmem:[#allocation6_spill] sm:$0xff] %v2080_v48  ;;  %v719_v59 = vld [vmem:[%s2592_s3 + $0x38] sm:$0xff]  ;;  %v896_v60 = vand.u32 4294901760, %v895_v43  ;;  %v2104_v1 = vsub.f32 %v720_v19, %v2082_v49  ;;  %v2597_v9 = vand.u32 4294901760, %v2093_v58  ;;  %v718_v11 = vld [vmem:[%s2592_s3 + $0x30] sm:$0xff] }
  0x1a   :  { %1632 = vmatprep.subr.mxu0 %v1942_v33  ;;  %1666 = vmatpush3.msra.mxu1 %v875_v0  ;;  %v1007_v30 = vsub.f32 %v2028_v7, %v2603_v16  ;;  %v2596_v0 = vand.u32 4294901760, %v2080_v48  ;;  %v1021_v6 = vsub.f32 %v2070_v38, %v2598_v55  ;;  %v903_v14 = vand.u32 4294901760, %v902_v63  ;;  %v717_v63 = vld [vmem:[%s2592_s3 + $0x28] sm:$0xff] }
  0x1b   :  { %1633 = vmatpush3.msra.mxu0 %v1952_v37  ;;  %1667 = vmatprep.subr.mxu1 %v994_v5  ;;  %2706 = vst [vmem:[#allocation8_spill] sm:$0xff] %v2104_v1  ;;  %v1015_v5 = vand.u32 4294901760, %v1014_v54  ;;  %v2600_v19 = vand.u32 4294901760, %v2104_v1 }
  0x1c   :  { %1634 = vmatprep.subr.mxu0 %v1965_v42  ;;  %1668 = vmatpush3.msra.mxu1 %v882_v10  ;;  %v1008_v53 = vand.u32 4294901760, %v1007_v30  ;;  %v2114_v10 = vand.u32 4294901760, %v735_v50  ;;  %v733_v30 = vld [vmem:[%s2592_s3 + $0xa8] sm:$0xff]  ;;  %v1022_v43 = vand.u32 4294901760, %v1021_v6 }
  0x1d   :  { %1635 = vmatpush3.msra.mxu0 %v1978_v47  ;;  %1669 = vmatprep.subr.mxu1 %v1001_v15  ;;  %v909_v15 = vsub.f32 %v2080_v48, %v2596_v0  ;;  %v2156_v44 = vand.u32 4294901760, %v733_v30 }
  0x1e   :  { %1636 = vmatprep.subr.mxu0 %v2010_v62  ;;  %1670 = vmatpush3.msra.mxu1 %v889_v20  ;;  %v2123_v20 = vand.u32 4294901760, %v719_v59  ;;  %v2132_v54 = vsub.f32 %v735_v50, %v2114_v10  ;;  %v732_v50 = vld [vmem:[%s2592_s3 + $0xa0] sm:$0xff] }
  0x1f   :  { %1637 = vmatpush3.msra.mxu0 %v2019_v3  ;;  %1671 = vmatprep.subr.mxu1 %v1008_v53  ;;  %v1028_v53 = vsub.f32 %v2093_v58, %v2597_v9  ;;  %v910_v0 = vand.u32 4294901760, %v909_v15  ;;  %v2146_v9 = vand.u32 4294901760, %v718_v11  ;;  %2711 = vst [vmem:[#allocation13_spill] sm:$0xff] %v2156_v44  ;;  %v2174_v16 = vsub.f32 %v733_v30, %v2156_v44  ;;  %v731_v30 = vld [vmem:[%s2592_s3 + $0x98] sm:$0xff] }
  0x20   :  { %1638 = vmatprep.subr.mxu0 %v2030_v8  ;;  %1672 = vmatpush3.msra.mxu1 %v896_v60  ;;  %2707 = vst [vmem:[#allocation9_spill] sm:$0xff] %v2132_v54  ;;  %v2134_v60 = vand.u32 4294901760, %v734_v4  ;;  %v2144_v6 = vsub.f32 %v719_v59, %v2123_v20  ;;  %v716_v59 = vld [vmem:[%s2592_s3 + $0x20] sm:$0xff] }
  0x21   :  { %1639 = vmatpush3.msra.mxu0 %v2042_v13  ;;  %1673 = vmatprep.subr.mxu1 %v1015_v5  ;;  %v916_v5 = vsub.f32 %v2104_v1, %v2600_v19  ;;  %2709 = vst [vmem:[#allocation11_spill] sm:$0xff] %v2146_v9  ;;  %v1029_v55 = vand.u32 4294901760, %v1028_v53  ;;  %v2166_v53 = vand.u32 4294901760, %v717_v63  ;;  %2714 = vst [vmem:[#allocation16_spill] sm:$0xff] %v2174_v16 }
  0x22   :  { %1640 = vmatprep.subr.mxu0 %v2052_v18  ;;  %1674 = vmatpush3.msra.mxu1 %v903_v14  ;;  %2708 = vst [vmem:[#allocation10_spill] sm:$0xff] %v2144_v6  ;;  %v2604_v14 = vand.u32 4294901760, %v2132_v54  ;;  %v2154_v15 = vsub.f32 %v734_v4, %v2134_v60  ;;  %v2606_v34 = vand.u32 4294901760, %v2144_v6 }
  0x23   :  { %1641 = vmatpush3.msra.mxu0 %v2062_v27  ;;  %1675 = vmatprep.subr.mxu1 %v1022_v43  ;;  %v917_v19 = vand.u32 4294901760, %v916_v5  ;;  %v2164_v43 = vsub.f32 %v718_v11, %v2146_v9  ;;  %2713 = vst [vmem:[#allocation15_spill] sm:$0xff] %v2166_v53  ;;  %v2184_v5 = vsub.f32 %v717_v63, %v2166_v53  ;;  %v715_v63 = vld [vmem:[%s2592_s3 + $0x18] sm:$0xff] }
  0x24   :  { %1642 = vmatprep.subr.mxu0 %v2072_v39  ;;  %2710 = vst [vmem:[#allocation12_spill] sm:$0xff] %v2154_v15  ;;  %1676 = vmatpush3.msra.mxu1 %v910_v0  ;;  %v1035_v4 = vsub.f32 %v2132_v54, %v2604_v14  ;;  %v2610_v22 = vand.u32 4294901760, %v2154_v15  ;;  %v2176_v0 = vand.u32 4294901760, %v732_v50  ;;  %v923_v11 = vsub.f32 %v2144_v6, %v2606_v34 }
  0x25   :  { %1643 = vmatpush3.msra.mxu0 %v2082_v49  ;;  %2712 = vst [vmem:[#allocation14_spill] sm:$0xff] %v2164_v43  ;;  %1677 = vmatprep.subr.mxu1 %v1029_v55  ;;  %v2613_v55 = vand.u32 4294901760, %v2164_v43  ;;  %2716 = vst [vmem:[#allocation18_spill] sm:$0xff] %v2184_v5  ;;  %v2186_v14 = vand.u32 4294901760, %v716_v59  ;;  %v2616_v34 = vand.u32 4294901760, %v2174_v16  ;;  %v2621_v51 = vand.u32 4294901760, %v2184_v5 }
  0x26   :  { %1644 = vmatprep.subr.mxu0 %v2114_v10  ;;  %2715 = vst [vmem:[#allocation17_spill] sm:$0xff] %v2176_v0  ;;  %1678 = vmatpush3.msra.mxu1 %v917_v19  ;;  %v1036_v2 = vand.u32 4294901760, %v1035_v4  ;;  %v1042_v19 = vsub.f32 %v2154_v15, %v2610_v22  ;;  %v2197_v61 = vsub.f32 %v732_v50, %v2176_v0  ;;  %v924_v56 = vand.u32 4294901760, %v923_v11  ;;  %v730_v50 = vld [vmem:[%s2592_s3 + $0x90] sm:$0xff] }
  0x27   :  { %1645 = vmatpush3.msra.mxu0 %v2123_v20  ;;  %2717 = vst [vmem:[#allocation19_spill] sm:$0xff] %v2186_v14  ;;  %v930_v4 = vsub.f32 %v2164_v43, %v2613_v55  ;;  %v2208_v22 = vsub.f32 %v716_v59, %v2186_v14  ;;  %v1049_v11 = vsub.f32 %v2174_v16, %v2616_v34  ;;  %v2218_v55 = vand.u32 4294901760, %v731_v30  ;;  %v714_v59 = vld [vmem:[%s2592_s3 + $0x10] sm:$0xff]  ;;  %v729_v34 = vld [vmem:[%s2592_s3 + $0x88] sm:$0xff] }
  0x28   :  { %1646 = vmatprep.subr.mxu0 %v2134_v60  ;;  %2718 = vst [vmem:[#allocation20_spill] sm:$0xff] %v2197_v61  ;;  %1679 = vmatprep.subr.mxu1 %v1036_v2  ;;  %v1043_v45 = vand.u32 4294901760, %v1042_v19  ;;  %v937_v31 = vsub.f32 %v2184_v5, %v2621_v51  ;;  %v2227_v19 = vand.u32 4294901760, %v715_v63  ;;  %v2722_v16 = vand.u32 4294901760, %v2197_v61  ;;  %v713_v51 = vld [vmem:[%s2592_s3 + $0x8] sm:$0xff] }
  0x29   :  { %1647 = vmatpush3.msra.mxu0 %v2146_v9  ;;  %2719 = vst [vmem:[#allocation21_spill] sm:$0xff] %v2208_v22  ;;  %2720 = vst [vmem:[#allocation22_spill] sm:$0xff] %v2218_v55  ;;  %1680 = vmatpush3.msra.mxu1 %v924_v56  ;;  %v931_v35 = vand.u32 4294901760, %v930_v4  ;;  %v1050_v40 = vand.u32 4294901760, %v1049_v11  ;;  %v2236_v56 = vsub.f32 %v731_v30, %v2218_v55  ;;  %v2238_v4 = vand.u32 4294901760, %v730_v50  ;;  %v728_v30 = vld [vmem:[%s2592_s3 + $0x80] sm:$0xff] }
  0x2a   :  { %1648 = vmatprep.subr.mxu0 %v2156_v44  ;;  %2721 = vst [vmem:[#allocation23_spill] sm:$0xff] %v2227_v19  ;;  %1681 = vmatprep.subr.mxu1 %v1043_v45  ;;  %v1056_v43 = vsub.f32 %v2197_v61, %v2722_v16  ;;  %v938_v2 = vand.u32 4294901760, %v937_v31  ;;  %v2725_v45 = vand.u32 4294901760, %v2208_v22  ;;  %v2248_v5 = vsub.f32 %v715_v63, %v2227_v19  ;;  %v712_v63 = vld [vmem:[%s2592_s3] sm:$0xff] }
  0x2b   :  { %1649 = vmatpush3.msra.mxu0 %v2166_v53  ;;  %2723 = vst [vmem:[#allocation24_spill] sm:$0xff] %v2236_v56  ;;  %2724 = vst [vmem:[#allocation25_spill] sm:$0xff] %v2238_v4  ;;  %1682 = vmatpush3.msra.mxu1 %v931_v35  ;;  %v2250_v16 = vand.u32 4294901760, %v714_v59  ;;  %v2634_v35 = vand.u32 4294901760, %v2236_v56  ;;  %v2258_v31 = vsub.f32 %v730_v50, %v2238_v4  ;;  %v2260_v15 = vand.u32 4294901760, %v729_v34 }
  0x2c   :  { %1650 = vmatprep.subr.mxu0 %v2176_v0  ;;  %v944_v11 = vsub.f32 %v2208_v22, %v2725_v45  ;;  %2726 = vst [vmem:[#allocation26_spill] sm:$0xff] %v2248_v5  ;;  %1683 = vmatprep.subr.mxu1 %v1050_v40  ;;  %v1057_v61 = vand.u32 4294901760, %v1056_v43  ;;  %v2639_v22 = vand.u32 4294901760, %v2248_v5  ;;  %v2270_v43 = vand.u32 4294901760, %v713_v51 }
  0x2d   :  { %1651 = vmatpush3.msra.mxu0 %v2186_v14  ;;  %2727 = vst [vmem:[#allocation27_spill] sm:$0xff] %v2250_v16  ;;  %2728 = vst [vmem:[#allocation28_spill] sm:$0xff] %v2258_v31  ;;  %1684 = vmatpush3.msra.mxu1 %v938_v2  ;;  %v2268_v40 = vsub.f32 %v714_v59, %v2250_v16  ;;  %v1063_v50 = vsub.f32 %v2236_v56, %v2634_v35  ;;  %v2280_v2 = vand.u32 4294901760, %v728_v30 }
  0x2e   :  { %1652 = vmatprep.subr.mxu0 %v2218_v55  ;;  %2729 = vst [vmem:[#allocation29_spill] sm:$0xff] %v2260_v15  ;;  %v945_v45 = vand.u32 4294901760, %v944_v11  ;;  %2731 = vst [vmem:[#allocation31_spill] sm:$0xff] %v2270_v43  ;;  %1685 = vmatprep.subr.mxu1 %v1057_v61  ;;  %v951_v59 = vsub.f32 %v2248_v5, %v2639_v22  ;;  %v2288_v11 = vsub.f32 %v713_v51, %v2270_v43  ;;  %v1867_v55 = vmov 1326507024  }
  0x2f   :  { %1653 = vmatpush3.msra.mxu0 %v2227_v19  ;;  %2730 = vst [vmem:[#allocation30_spill] sm:$0xff] %v2268_v40  ;;  %v2642_v19 = vand.u32 4294901760, %v2258_v31  ;;  %2733 = vst [vmem:[#allocation33_spill] sm:$0xff] %v2280_v2  ;;  %v2645_v61 = vand.u32 4294901760, %v2268_v40  ;;  %v2290_v35 = vand.u32 4294901760, %v712_v63 }
  0x30   :  { %1654 = vmatprep.subr.mxu0 %v2238_v4  ;;  %v2278_v4 = vsub.f32 %v729_v34, %v2260_v15  ;;  %1686 = vmatpush3.msra.mxu1 %v945_v45  ;;  %2734 = vst [vmem:[#allocation34_spill] sm:$0xff] %v2288_v11  ;;  %v1064_v34 = vand.u32 4294901760, %v1063_v50  ;;  %v952_v22 = vand.u32 4294901760, %v951_v59  ;;  %v2649_v5 = vand.u32 4294901760, %v2288_v11 }
  0x31   :  { %1655 = vmatpush3.msra.mxu0 %v2250_v16  ;;  %2735 = vst [vmem:[#allocation35_spill] sm:$0xff] %v2290_v35  ;;  %v1070_v56 = vsub.f32 %v2258_v31, %v2642_v19  ;;  %v958_v51 = vsub.f32 %v2268_v40, %v2645_v61  ;;  %v2306_v50 = vsub.f32 %v712_v63, %v2290_v35 }
  0x32   :  { %2732 = vst [vmem:[#allocation32_spill] sm:$0xff] %v2278_v4  ;;  %1656 = vmatprep.subr.mxu0 %v2260_v15  ;;  %v2648_v45 = vand.u32 4294901760, %v2278_v4  ;;  %v2298_v15 = vsub.f32 %v728_v30, %v2280_v2  ;;  %1687 = vmatprep.subr.mxu1 %v1064_v34  ;;  %v965_v61 = vsub.f32 %v2288_v11, %v2649_v5 }
  0x33   :  { %1657 = vmatpush3.msra.mxu0 %v2270_v43  ;;  %2737 = vst [vmem:[#allocation37_spill] sm:$0xff] %v2306_v50  ;;  %v1071_v19 = vand.u32 4294901760, %v1070_v56  ;;  %1688 = vmatpush3.msra.mxu1 %v952_v22  ;;  %v959_v59 = vand.u32 4294901760, %v958_v51  ;;  %v2660_v63 = vand.u32 4294901760, %v2306_v50 }
  0x34   :  { %2736 = vst [vmem:[#allocation36_spill] sm:$0xff] %v2298_v15  ;;  %1658 = vmatprep.subr.mxu0 %v2280_v2  ;;  %v1077_v30 = vsub.f32 %v2278_v4, %v2648_v45  ;;  %v2653_v31 = vand.u32 4294901760, %v2298_v15  ;;  %v966_v34 = vand.u32 4294901760, %v965_v61 }
  0x35   :  { %1659 = vmatpush3.msra.mxu0 %v2290_v35  ;;  %1689 = vmatprep.subr.mxu1 %v1071_v19  ;;  %v972_v45 = vsub.f32 %v2306_v50, %v2660_v63  ;;  %v494_v19 = vlaneseq }
  0x36   :  { %1698 = vmatprep.subr.mxu0 %v1921_v25  ;;  %v1078_v40 = vand.u32 4294901760, %v1077_v30  ;;  %v1084_v56 = vsub.f32 %v2298_v15, %v2653_v31  ;;  %1690 = vmatpush3.msra.mxu1 %v959_v59 }
  0x37   :  { %v973_v51 = vand.u32 4294901760, %v972_v45  ;;  %v495_v25 = vshrl.u32 %v494_v19, 7  ;;  %v492_v45 = vld [vmem:[%s2593_s2] sm:$0x3] }
  0x38   :  { %1691 = vmatprep.subr.mxu1 %v1078_v40  ;;  %v1085_v22 = vand.u32 4294901760, %v1084_v56 }
  0x39   :  { %1692 = vmatpush3.msra.mxu1 %v966_v34  ;;  %v496_v63 = vsub.s32 0, %v495_v25 }
  0x3a   :  { %1693 = vmatprep.subr.mxu1 %v1085_v22 }
  0x3b   :  { %1694 = vmatpush3.msra.mxu1 %v973_v51  ;;  %v500_v51 = vsub.s32 1, %v495_v25 }
  0x3c   :  { %1733 = vmatprep.subr.mxu1 %v1910_v21 }
  0xce   :  { %v100_v30 = vpop.f32.mrf.mxu0  ;;  %v182_v5 = vpop.f32.mrf.mxu1 }
  0xcf   :  { %v183_v11 = vadd.f32 %v182_v5, %v100_v30  ;;  %v497_v30 = vrot.slane %v492_v45, %v496_v63 }
  0xd0   :  { %v102_v31 = vpop.f32.mrf.mxu0  ;;  %v184_v59 = vpop.f32.mrf.mxu1 }
  0xd1   :  { %v185_v61 = vadd.f32 %v184_v59, %v102_v31 }
  0xd2   :  { %v259_v15 = vpop.f32.mrf.mxu0  ;;  %v335_v35 = vpop.f32.mrf.mxu1 }
  0xd3   :  { %v260_v4 = vadd.f32 %v259_v15, %v183_v11  ;;  %v501_v11 = vrot.slane %v492_v45, %v500_v51 }
  0xd4   :  { %v261_v40 = vpop.f32.mrf.mxu0  ;;  %v337_v22 = vpop.f32.mrf.mxu1 }
  0xd5   :  { %v336_v56 = vadd.f32 %v335_v35, %v260_v4  ;;  %v262_v34 = vadd.f32 %v261_v40, %v185_v61 }
  0xd6   :  { %v413_v50 = vpop.f32.mrf.mxu0  ;;  %v487_v5 = vpop.f32.mrf.mxu1 }
  0xd7   :  { %v338_v21 = vadd.f32 %v337_v22, %v262_v34  ;;  %v414_v19 = vadd.f32 %v413_v50, %v336_v56 }
  0xd8   :  { %v415_v2 = vpop.f32.mrf.mxu0  ;;  %v489_v15 = vpop.f32.mrf.mxu1 }
  0xd9   :  { %v488_v31 = vadd.f32 %v487_v5, %v414_v19  ;;  %v416_v59 = vadd.f32 %v415_v2, %v338_v21 }
  0xdb   :  { %v2328_v43 = vmul.f32 %v497_v30, %v488_v31  ;;  %v490_v16 = vadd.f32 %v489_v15, %v416_v59  ;;  %v2694_v31 = vmov 683565275  }
  0xdd   :  { %v2673_v6 = vand.u32 2147483647, %v2328_v43  ;;  %v509_v4 = vand.u32 2139095040, %v2328_v43  ;;  %v2332_v35 = vmul.f32 %v501_v11, %v490_v16  ;;  %v1863_v11 = vmov 2475754826  }
  0xde   :  { %vm508_vm15 = vcmp.lt.s32.totalorder %v2328_v43, 0 }
  0xdf   :  { %v510_v25 = vshrl.u32 %v509_v4, 23  ;;  %v513_v50 = vand.u32 8388607, %v2673_v6  ;;  %v612_v63 = vand.u32 2139095040, %v2332_v35  ;;  %v2672_v21 = vand.u32 2147483647, %v2332_v35 }
  0xe1   :  { %v1619_v61 = vadd.s32 4294967169, %v510_v25  ;;  %v613_v2 = vshrl.u32 %v612_v63, 23  ;;  %v514_v45 = vor.u32 8388608, %v513_v50  ;;  %v616_v34 = vand.u32 8388607, %v2672_v21 }
  0xe2   :  { %v1864_v25 = vmov 2131351028   ;;  %v1865_v63 = vmov 2102212464  }
  0xe3   :  { %v516_v40 = vadd.s32 1, %v1619_v61  ;;  %v1623_v56 = vadd.s32 4294967169, %v613_v2  ;;  %v2340_v5 = vshll.u32 %v514_v45, 8  ;;  %v617_v15 = vor.u32 8388608, %v616_v34 }
  0xe4   :  { %v1866_v2 = vmov 920167782  }
  0xe5   :  { %vm517_vm1 = vcmp.gt.s32.totalorder %v516_v40, 0  ;;  %v619_v16 = vadd.s32 1, %v1623_v56 }
  0xe6   :  { %v518_v22 = vsel %vm517_vm1, %v516_v40, 0  ;;  %vm611_vm1 = vcmp.lt.s32.totalorder %v2332_v35, 0 }
  0xe7   :  { %v519_v51 = vshrl.u32 %v518_v22, 5  ;;  %v520_v19 = vand.u32 31, %v518_v22  ;;  %vm620_vm2 = vcmp.gt.s32.totalorder %v619_v16, 0 }
  0xe8   :  { %v621_v0 = vsel %vm620_vm2, %v619_v16, 0 }
  0xe9   :  { %v521_v30 = vsub.s32 32, %v520_v19  ;;  %v523_v59 = vshll.u32 %v2694_v31, %v520_v19  ;;  %v526_v4 = vshll.u32 %v1863_v11, %v520_v19  ;;  %v529_v50 = vshll.u32 %v1864_v25, %v520_v19 }
  0xea   :  { %v532_v61 = vshll.u32 %v1865_v63, %v520_v19  ;;  %v535_v21 = vshll.u32 %v1866_v2, %v520_v19  ;;  %vm538_vm3 = vcmp.lt.s32.totalorder %v519_v51, 1  ;;  %vm540_vm4 = vcmp.lt.s32.totalorder %v519_v51, 3 }
  0xeb   :  { %v524_v40 = vshrl.u32 %v1863_v11, %v521_v30  ;;  %v527_v56 = vshrl.u32 %v1864_v25, %v521_v30  ;;  %v530_v6 = vshrl.u32 %v1865_v63, %v521_v30  ;;  %v522_v45 = vshrl.u32 %v2694_v31, %v521_v30 }
  0xec   :  { %v533_v22 = vshrl.u32 %v1866_v2, %v521_v30  ;;  %v536_v54 = vshrl.u32 %v1867_v55, %v521_v30  ;;  %vm541_vm5 = vcmp.lt.s32.totalorder %v519_v51, 4  ;;  %v623_v48 = vand.u32 31, %v621_v0 }
  0xed   :  { %v525_v34 = vor.u32 %v524_v40, %v523_v59  ;;  %v528_v14 = vor.u32 %v527_v56, %v526_v4  ;;  %v531_v1 = vor.u32 %v530_v6, %v529_v50  ;;  %vm539_vm6 = vcmp.lt.s32.totalorder %v519_v51, 2 }
  0xee   :  { %v534_v58 = vor.u32 %v533_v22, %v532_v61  ;;  %v537_v53 = vor.u32 %v536_v54, %v535_v21  ;;  %v624_v59 = vsub.s32 32, %v623_v48  ;;  %v657_v54 = vshll.u32 %v617_v15, 8 }
  0xef   :  { %v542_v19 = vsel %vm538_vm3, %v522_v45, %v525_v34  ;;  %v543_v44 = vsel %vm541_vm5, %v531_v1, 2102212464  ;;  %v546_v38 = vsel %vm538_vm3, %v525_v34, %v528_v14  ;;  %v550_v31 = vsel %vm538_vm3, %v528_v14, %v531_v1 }
  0xf0   :  { %v544_v9 = vsel %vm540_vm4, %v528_v14, %v543_v44  ;;  %v547_v30 = vsel %vm541_vm5, %v534_v58, 920167782  ;;  %v551_v24 = vsel %vm541_vm5, %v537_v53, 1326507024  ;;  %v622_v61 = vshrl.u32 %v621_v0, 5 }
  0xf1   :  { %v548_v6 = vsel %vm540_vm4, %v531_v1, %v547_v30  ;;  %v552_v16 = vsel %vm540_vm4, %v534_v58, %v551_v24  ;;  %v545_v21 = vsel %vm539_vm6, %v542_v19, %v544_v9  ;;  %v2738_v14 = vmov 683565275  }
  0xf2   :  { %v549_v4 = vsel %vm539_vm6, %v546_v38, %v548_v6  ;;  %v553_v50 = vsel %vm539_vm6, %v550_v31, %v552_v16  ;;  %v626_v53 = vshll.u32 %v2738_v14, %v623_v48  ;;  %v627_v22 = vshrl.u32 %v1863_v11, %v624_v59 }
  0xf3   :  { %v2352_v40 = vmul.u32.u64.low %v2340_v5, %v553_v50  ;;  %v2353_v56 = vmul.u32.u64.high %v2340_v5, %v553_v50, %v2352_v40  ;;  %v2356_v45 = vmul.u32.u64.low %v2340_v5, %v549_v4  ;;  %v2357_v44 = vmul.u32.u64.high %v2340_v5, %v549_v4, %v2356_v45 }
  0xf4   :  { %v629_v1 = vshll.u32 %v1863_v11, %v623_v48  ;;  %v630_v51 = vshrl.u32 %v1864_v25, %v624_v59  ;;  %v632_v24 = vshll.u32 %v1864_v25, %v623_v48  ;;  %v633_v58 = vshrl.u32 %v1865_v63, %v624_v59 }
  0xf5   :  { %v635_v9 = vshll.u32 %v1865_v63, %v623_v48  ;;  %v636_v38 = vshrl.u32 %v1866_v2, %v624_v59  ;;  %v628_v31 = vor.u32 %v627_v22, %v626_v53  ;;  %v638_v15 = vshll.u32 %v1866_v2, %v623_v48 }
  0xf6   :  { %v631_v0 = vor.u32 %v630_v51, %v629_v1  ;;  %v639_v34 = vshrl.u32 %v1867_v55, %v624_v59  ;;  %v561_v19 = vmul.u32 %v2340_v5, %v545_v21  ;;  %vm563_vm7 = vc.u32 %v2353_v56, %v2356_v45 }
  0xf7   :  { %v564_v30 = vadd.s32 1, %v2357_v44  ;;  %v634_v6 = vor.u32 %v633_v58, %v632_v24  ;;  %v625_v16 = vshrl.u32 %v2738_v14, %v624_v59  ;;  %v637_v11 = vor.u32 %v636_v38, %v635_v9 }
  0xf8   :  { %v640_v4 = vor.u32 %v639_v34, %v638_v15  ;;  %vm641_vm8 = vcmp.lt.s32.totalorder %v622_v61, 1  ;;  %vm643_vm9 = vcmp.lt.s32.totalorder %v622_v61, 3  ;;  %vm644_vm10 = vcmp.lt.s32.totalorder %v622_v61, 4 }
  0xf9   :  { %v565_v25 = vsel %vm563_vm7, %v564_v30, %v2357_v44  ;;  %v649_v63 = vsel %vm641_vm8, %v628_v31, %v631_v0  ;;  %v646_v55 = vsel %vm644_vm10, %v634_v6, 2102212464  ;;  %v650_v2 = vsel %vm644_vm10, %v637_v11, 920167782 }
  0xfa   :  { %v566_v48 = vadd.s32 %v565_v25, %v561_v19  ;;  %v653_v5 = vsel %vm641_vm8, %v631_v0, %v634_v6  ;;  %vm642_vm11 = vcmp.lt.s32.totalorder %v622_v61, 2  ;;  %v645_v21 = vsel %vm641_vm8, %v625_v16, %v628_v31 }
  0xfb   :  { %v651_v50 = vsel %vm643_vm9, %v634_v6, %v650_v2  ;;  %v654_v40 = vsel %vm644_vm10, %v640_v4, 1326507024  ;;  %v647_v22 = vsel %vm643_vm9, %v631_v0, %v646_v55  ;;  %vm598_vm6 = vweird.f32 %v2328_v43 }
  0xfc   :  { %v567_v53 = vadd.s32 536870912, %v566_v48  ;;  %v652_v1 = vsel %vm642_vm11, %v649_v63, %v651_v50  ;;  %v655_v59 = vsel %vm643_vm9, %v637_v11, %v654_v40  ;;  %v648_v38 = vsel %vm642_vm11, %v645_v21, %v647_v22 }
  0xfd   :  { %v656_v14 = vsel %vm642_vm11, %v653_v5, %v655_v59  ;;  %v2367_v51 = vmul.u32.u64.low %v657_v54, %v652_v1  ;;  %v2368_v24 = vmul.u32.u64.high %v657_v54, %v652_v1, %v2367_v51  ;;  %v664_v31 = vmul.u32 %v657_v54, %v648_v38 }
  0xfe   :  { %v568_v44 = vshrl.u32 %v567_v53, 30  ;;  %v2370_v58 = vmul.u32.u64.low %v657_v54, %v656_v14  ;;  %v2371_v9 = vmul.u32.u64.high %v657_v54, %v656_v14, %v2370_v58  ;;  %v562_v5 = vadd.s32 %v2356_v45, %v2353_v56 }
  0xff   :  { %v667_v34 = vadd.s32 1, %v2368_v24  ;;  %vm701_vm10 = vweird.f32 %v2332_v35 }
 0x100   :  { %v569_v15 = vshll.u32 %v568_v44, 30  ;;  %vm666_vm12 = vc.u32 %v2371_v9, %v2367_v51 }
 0x101   :  { %v668_v0 = vsel %vm666_vm12, %v667_v34, %v2368_v24 }
 0x102   :  { %v570_v61 = vsub.s32 %v566_v48, %v569_v15  ;;  %v669_v30 = vadd.s32 %v668_v0, %v664_v31  ;;  %v665_v0 = vadd.s32 %v2367_v51, %v2371_v9 }
 0x104   :  { %v572_v19 = vsub.s32 0, %v570_v61  ;;  %v670_v16 = vadd.s32 536870912, %v669_v30 }
 0x106   :  { %v1620_v6 = vmin.u32 %v572_v19, %v570_v61  ;;  %v671_v4 = vshrl.u32 %v670_v16, 30  ;;  %v2739_v16 = vand.u32 2147483647, %v2328_v43 }
 0x108   :  { %v574_v11 = vclz %v1620_v6  ;;  %v672_v63 = vshll.u32 %v671_v4, 30  ;;  %vm2382_vm0 = vcmp.le.f32.partialorder %v2739_v16, 0.7853982 }
 0x10a   :  { %v1621_v25 = vadd.s32 4294967294, %v574_v11  ;;  %v673_v55 = vsub.s32 %v669_v30, %v672_v63 }
 0x10c   :  { %vm1622_vm13 = vcmp.lt.s32.totalorder %v1621_v25, 0  ;;  %v675_v21 = vsub.s32 0, %v673_v55 }
 0x10d   :  { %v577_v2 = vsel %vm1622_vm13, 0, %v1621_v25 }
 0x10e   :  { %v578_v48 = vsub.s32 32, %v577_v2  ;;  %v582_v54 = vsub.s32 4294967266, %v577_v2  ;;  %v579_v50 = vshll.u32 %v570_v61, %v577_v2  ;;  %v1624_v22 = vmin.u32 %v675_v21, %v673_v55 }
 0x110   :  { %v580_v40 = vshrl.u32 %v562_v5, %v578_v48  ;;  %v583_v53 = vadd.s32 127, %v582_v54  ;;  %v677_v14 = vclz %v1624_v22 }
 0x112   :  { %v581_v1 = vor.u32 %v580_v40, %v579_v50  ;;  %v584_v59 = vshll.u32 %v583_v53, 23  ;;  %v1625_v58 = vadd.s32 4294967294, %v677_v14  ;;  %v2742_v40 = vand.u32 2147483647, %v2332_v35  ;;  %v2746_v53 = vld [vmem:[#allocation11_spill] sm:$0xff] }
 0x113   :  { %v695_v14 = vsub.s32 4, %v671_v4 }
 0x114   :  { %v585_v24 = vor.u32 4788187, %v584_v59  ;;  %v588_v15 = vcvt.s32.f32 %v581_v1  ;;  %vm1626_vm14 = vcmp.lt.s32.totalorder %v1625_v58, 0  ;;  %vm2392_vm2 = vcmp.le.f32.partialorder %v2742_v40, 0.7853982  ;;  %v2745_v40 = vld [vmem:[#allocation4_spill] sm:$0xff] }
 0x115   :  { %v680_v34 = vsel %vm1626_vm14, 0, %v1625_v58 }
 0x116   :  { %v586_v38 = vand.u32 2147483647, %v585_v24  ;;  %v681_v56 = vsub.s32 32, %v680_v34  ;;  %v685_v45 = vsub.s32 4294967266, %v680_v34  ;;  %v682_v30 = vshll.u32 %v673_v55, %v680_v34 }
 0x117   :  { %v592_v55 = vsub.s32 4, %v568_v44 }
 0x118   :  { %v589_v31 = vmul.f32 %v588_v15, %v586_v38  ;;  %v683_v61 = vshrl.u32 %v665_v0, %v681_v56  ;;  %v686_v6 = vadd.s32 127, %v685_v45  ;;  %v696_v15 = vsel %vm611_vm1, %v695_v14, %v671_v4  ;;  %v2750_v14 = vld [vmem:[#allocation15_spill] sm:$0xff] }
 0x119   :  { %v593_v21 = vsel %vm508_vm15, %v592_v55, %v568_v44  ;;  %v698_v56 = vsel %vm2392_vm2, 0, %v696_v15  ;;  %v2755_v15 = vld [vmem:[#allocation9_spill] sm:$0xff] }
 0x11a   :  { %v590_v19 = vxor.u32 2147483648, %v589_v31  ;;  %v684_v63 = vor.u32 %v683_v61, %v682_v30  ;;  %v687_v2 = vshll.u32 %v686_v6, 23  ;;  %v595_v1 = vsel %vm2382_vm0, 0, %v593_v21 }
 0x11b   :  { %v599_v44 = vand.u32 3, %v595_v1  ;;  %v702_v30 = vand.u32 3, %v698_v56  ;;  %v2748_v1 = vld [vmem:[#allocation13_spill] sm:$0xff]  ;;  %v2759_v56 = vld [vmem:[#allocation12_spill] sm:$0xff] }
 0x11c   :  { %v591_v25 = vsel %vm508_vm15, %v590_v19, %v589_v31  ;;  %v688_v9 = vor.u32 4788187, %v687_v2  ;;  %v691_v48 = vcvt.s32.f32 %v684_v63 }
 0x11d   :  { %v594_v51 = vsel %vm2382_vm0, %v2328_v43, %v591_v25  ;;  %vm604_vm3 = vcmp.eq.s32.totalorder %v599_v44, 2  ;;  %vm601_vm4 = vcmp.eq.s32.totalorder %v599_v44, 0  ;;  %vm600_vm5 = vcmp.lt.s32.totalorder %v599_v44, 2  ;;  %v2751_v44 = vld [vmem:[#allocation7_spill] sm:$0xff] }
 0x11e   :  { %1853 = vcosq.f32 %v594_v51  ;;  %v689_v5 = vand.u32 2147483647, %v688_v9  ;;  %vm707_vm7 = vcmp.eq.s32.totalorder %v702_v30, 2  ;;  %vm704_vm8 = vcmp.eq.s32.totalorder %v702_v30, 0 }
 0x11f   :  { %1855 = vsinq.f32 %v594_v51  ;;  %vm703_vm9 = vcmp.lt.s32.totalorder %v702_v30, 2  ;;  %v2762_v30 = vld [vmem:[#allocation27_spill] sm:$0xff] }
 0x120   :  { %v692_v54 = vmul.f32 %v691_v48, %v689_v5 }
 0x122   :  { %v693_v50 = vxor.u32 2147483648, %v692_v54 }
 0x124   :  { %v694_v22 = vsel %vm611_vm1, %v693_v50, %v692_v54 }
 0x125   :  { %v697_v59 = vsel %vm2392_vm2, %v2332_v35, %v694_v22  ;;  %v2747_v22 = vld [vmem:[#allocation5_spill] sm:$0xff] }
 0x126   :  { %1857 = vcosq.f32 %v697_v59 }
 0x127   :  { %1859 = vsinq.f32 %v697_v59  ;;  %v2749_v59 = vld [vmem:[#allocation6_spill] sm:$0xff] }
 0x12b   :  { %v1854_v24 = vpop.eup %1853 }
 0x12c   :  { %v1856_v58 = vpop.eup %1855  ;;  %v605_v38 = vxor.u32 2147483648, %v1854_v24 }
 0x12d   :  { %v602_v34 = vxor.u32 2147483648, %v1856_v58 }
 0x12e   :  { %v606_v31 = vsel %vm604_vm3, %v605_v38, %v1856_v58  ;;  %v2753_v58 = vld [vmem:[#allocation8_spill] sm:$0xff]  ;;  %v2754_v38 = vld [vmem:[#allocation19_spill] sm:$0xff] }
 0x12f   :  { %v603_v0 = vsel %vm601_vm4, %v1854_v24, %v602_v34  ;;  %v2752_v24 = vld [vmem:[#allocation17_spill] sm:$0xff]  ;;  %v2756_v34 = vld [vmem:[#allocation22_spill] sm:$0xff] }
 0x130   :  { %v607_v45 = vsel %vm600_vm5, %v603_v0, %v606_v31  ;;  %v2757_v31 = vld [vmem:[#allocation10_spill] sm:$0xff]  ;;  %v2758_v0 = vld [vmem:[#allocation23_spill] sm:$0xff] }
 0x131   :  { %v608_v19 = vsel %vm598_vm6, nan, %v607_v45  ;;  %v2760_v45 = vld [vmem:[#allocation25_spill] sm:$0xff] }
 0x132   :  { %v2404_v6 = vand.u32 4294901760, %v608_v19 }
 0x133   :  { %v1858_v61 = vpop.eup %1857 }
 0x134   :  { %v1860_v16 = vpop.eup %1859  ;;  %v708_v11 = vxor.u32 2147483648, %v1858_v61  ;;  %v2407_v2 = vsub.f32 %v608_v19, %v2404_v6  ;;  %v2761_v19 = vld [vmem:[#allocation14_spill] sm:$0xff] }
 0x135   :  { %v705_v4 = vxor.u32 2147483648, %v1860_v16 }
 0x136   :  { %v709_v25 = vsel %vm707_vm7, %v708_v11, %v1860_v16  ;;  %v855_v55 = vand.u32 4294901760, %v2407_v2  ;;  %v2764_v16 = vld [vmem:[#allocation29_spill] sm:$0xff]  ;;  %v2765_v11 = vld [vmem:[#allocation18_spill] sm:$0xff] }
 0x137   :  { %v706_v63 = vsel %vm704_vm8, %v1858_v61, %v705_v4  ;;  %v2763_v61 = vld [vmem:[#allocation16_spill] sm:$0xff]  ;;  %v2766_v4 = vld [vmem:[#allocation31_spill] sm:$0xff] }
 0x138   :  { %v710_v51 = vsel %vm703_vm9, %v706_v63, %v709_v25  ;;  %v856_v35 = vsub.f32 %v2407_v2, %v855_v55  ;;  %v2767_v25 = vld [vmem:[#allocation20_spill] sm:$0xff]  ;;  %v2768_v63 = vld [vmem:[#allocation33_spill] sm:$0xff] }
 0x139   :  { %v711_v43 = vsel %vm701_vm10, nan, %v710_v51  ;;  %v2769_v51 = vld [vmem:[#allocation21_spill] sm:$0xff] }
 0x13a   :  { %v2410_v9 = vand.u32 4294901760, %v711_v43  ;;  %v857_v50 = vand.u32 4294901760, %v856_v35  ;;  %v2773_v35 = vld [vmem:[#allocation26_spill] sm:$0xff] }
 0x13c   :  { %1088 = vmatprep.mubr.f32.mxu1 %v2410_v9  ;;  %v848_v5 = vsub.f32 %v711_v43, %v2410_v9  ;;  %v2770_v43 = vld [vmem:[#allocation35_spill] sm:$0xff] }
 0x13d   :  { %1090 = vmatmul.mubr.f32.vlgmr.msra.gmra.mxu1 %v2404_v6 }
 0x13e   :  { %1734 = vmatpush3.msra.mxu1 %v1915_v23  ;;  %v849_v48 = vand.u32 4294901760, %v848_v5 }
 0x13f   :  { %1735 = vmatprep.subr.mxu1 %v1923_v26 }
 0x140   :  { %1736 = vmatpush3.msra.mxu1 %v1932_v29  ;;  %1332 = vmatprep.mubr.f32.mxu1 %v849_v48  ;;  %v850_v54 = vsub.f32 %v848_v5, %v849_v48  ;;  %v2772_v48 = vld [vmem:[#allocation2_spill] sm:$0xff] }
 0x141   :  { %1737 = vmatprep.subr.mxu1 %v1942_v33 }
 0x142   :  { %1738 = vmatpush3.msra.mxu1 %v1952_v37  ;;  %v851_v21 = vand.u32 4294901760, %v850_v54  ;;  %v2774_v54 = vld [vmem:[#allocation28_spill] sm:$0xff] }
 0x143   :  { %1739 = vmatprep.subr.mxu1 %v1965_v42 }
 0x144   :  { %1740 = vmatpush3.msra.mxu1 %v1978_v47  ;;  %852 = vmatprep.mubr.f32.mxu0 %v851_v21  ;;  %v2775_v21 = vld [vmem:[#allocation30_spill] sm:$0xff] }
 0x145   :  { %1741 = vmatprep.subr.mxu1 %v2010_v62  ;;  %858 = vmatmul.mubr.f32.vlgmr.msra.gmra.mxu0 %v857_v50  ;;  %v2776_v50 = vld [vmem:[#allocation32_spill] sm:$0xff] }
 0x146   :  { %1699 = vmatpush3.msra.mxu0 %v1930_v28  ;;  %1742 = vmatpush3.msra.mxu1 %v2019_v3 }
 0x147   :  { %1700 = vmatprep.subr.mxu0 %v1940_v32  ;;  %1225 = vmatprep.mubr.f32.mxu0 %v848_v5  ;;  %v2771_v5 = vld [vmem:[#allocation24_spill] sm:$0xff] }
 0x148   :  { %1743 = vmatprep.subr.mxu1 %v2030_v8  ;;  %1701 = vmatpush3.msra.mxu0 %v1950_v36 }
 0x149   :  { %1744 = vmatpush3.msra.mxu1 %v2042_v13  ;;  %1702 = vmatprep.subr.mxu0 %v1963_v41 }
 0x14a   :  { %1745 = vmatprep.subr.mxu1 %v2052_v18  ;;  %1703 = vmatpush3.msra.mxu0 %v1976_v46 }
 0x14b   :  { %1746 = vmatpush3.msra.mxu1 %v2062_v27  ;;  %1704 = vmatprep.subr.mxu0 %v1989_v52 }
 0x14c   :  { %1747 = vmatprep.subr.mxu1 %v2072_v39  ;;  %1705 = vmatpush3.msra.mxu0 %v2000_v57 }
 0x14d   :  { %1748 = vmatpush3.msra.mxu1 %v2082_v49  ;;  %1706 = vmatprep.subr.mxu0 %v2028_v7 }
 0x14e   :  { %1749 = vmatprep.subr.mxu1 %v2114_v10  ;;  %1707 = vmatpush3.msra.mxu0 %v2040_v12 }
 0x14f   :  { %1750 = vmatpush3.msra.mxu1 %v2123_v20  ;;  %1708 = vmatprep.subr.mxu0 %v2050_v17 }
 0x150   :  { %1751 = vmatprep.subr.mxu1 %v2134_v60  ;;  %1709 = vmatpush3.msra.mxu0 %v2745_v40 }
 0x151   :  { %1752 = vmatpush3.msra.mxu1 %v2746_v53  ;;  %1710 = vmatprep.subr.mxu0 %v2747_v22 }
 0x152   :  { %1753 = vmatprep.subr.mxu1 %v2748_v1  ;;  %1711 = vmatpush3.msra.mxu0 %v2749_v59 }
 0x153   :  { %1754 = vmatpush3.msra.mxu1 %v2750_v14  ;;  %1712 = vmatprep.subr.mxu0 %v2751_v44 }
 0x154   :  { %1755 = vmatprep.subr.mxu1 %v2752_v24  ;;  %1713 = vmatpush3.msra.mxu0 %v2753_v58 }
 0x155   :  { %1756 = vmatpush3.msra.mxu1 %v2754_v38  ;;  %1714 = vmatprep.subr.mxu0 %v2755_v15 }
 0x156   :  { %1757 = vmatprep.subr.mxu1 %v2756_v34  ;;  %1715 = vmatpush3.msra.mxu0 %v2757_v31 }
 0x157   :  { %1758 = vmatpush3.msra.mxu1 %v2758_v0  ;;  %1716 = vmatprep.subr.mxu0 %v2759_v56 }
 0x158   :  { %1759 = vmatprep.subr.mxu1 %v2760_v45  ;;  %1717 = vmatpush3.msra.mxu0 %v2761_v19 }
 0x159   :  { %1760 = vmatpush3.msra.mxu1 %v2762_v30  ;;  %1718 = vmatprep.subr.mxu0 %v2763_v61 }
 0x15a   :  { %1761 = vmatprep.subr.mxu1 %v2764_v16  ;;  %1719 = vmatpush3.msra.mxu0 %v2765_v11 }
 0x15b   :  { %1762 = vmatpush3.msra.mxu1 %v2766_v4  ;;  %1720 = vmatprep.subr.mxu0 %v2767_v25 }
 0x15c   :  { %1763 = vmatprep.subr.mxu1 %v2768_v63  ;;  %1721 = vmatpush3.msra.mxu0 %v2769_v51 }
 0x15d   :  { %1764 = vmatpush3.msra.mxu1 %v2770_v43  ;;  %1722 = vmatprep.subr.mxu0 %v2771_v5 }
 0x15e   :  { %1336 = vmatmul.mubr.f32.vlgmr.msra.gmra.mxu1 %v855_v55  ;;  %1803 = vmatprep.subr.mxu1 %v2772_v48  ;;  %v2777_v55 = vld [vmem:[#allocation34_spill] sm:$0xff]  ;;  %v2778_v48 = vld [vmem:[#allocation36_spill] sm:$0xff] }
 0x15f   :  { %1723 = vmatpush3.msra.mxu0 %v2773_v35  ;;  %1804 = vmatpush3.msra.mxu1 %v1915_v23  ;;  %v2779_v23 = vld [vmem:[#allocation37_spill] sm:$0xff] }
 0x160   :  { %1606 = vmatprep.mubr.f32.mxu1 %v2410_v9  ;;  %1724 = vmatprep.subr.mxu0 %v2774_v54 }
 0x161   :  { %1805 = vmatprep.subr.mxu1 %v1923_v26  ;;  %1725 = vmatpush3.msra.mxu0 %v2775_v21  ;;  %v2780_v26 = vld [vmem:[#allocation3_spill] sm:$0xff] }
 0x162   :  { %1806 = vmatpush3.msra.mxu1 %v1932_v29  ;;  %1726 = vmatprep.subr.mxu0 %v2776_v50  ;;  %v2781_v29 = vand.u32 4294901760, %v2780_v26 }
 0x163   :  { %1807 = vmatprep.subr.mxu1 %v1942_v33  ;;  %1727 = vmatpush3.msra.mxu0 %v2777_v55  ;;  %v2782_v33 = vand.u32 4294901760, %v1930_v28  ;;  %v2786_v28 = vand.u32 4294901760, %v1976_v46  ;;  %v2790_v46 = vand.u32 4294901760, %v2040_v12  ;;  %v2797_v12 = vand.u32 4294901760, %v2755_v15  ;;  %v1627_v15 = vld [vmem:[%s2594_s4] ss:$0 sm:$0xff] }
 0x164   :  { %1808 = vmatpush3.msra.mxu1 %v1952_v37  ;;  %1728 = vmatprep.subr.mxu0 %v2778_v48  ;;  %v2783_v37 = vand.u32 4294901760, %v1940_v32  ;;  %v2787_v32 = vand.u32 4294901760, %v1989_v52  ;;  %v2791_v52 = vand.u32 4294901760, %v2050_v17  ;;  %v2799_v17 = vand.u32 4294901760, %v2759_v56 }
 0x165   :  { %1809 = vmatprep.subr.mxu1 %v1965_v42  ;;  %1729 = vmatpush3.msra.mxu0 %v2779_v23  ;;  %v2784_v42 = vand.u32 4294901760, %v1950_v36  ;;  %v2788_v36 = vand.u32 4294901760, %v2000_v57  ;;  %v2792_v57 = vand.u32 4294901760, %v2745_v40  ;;  %v2809_v40 = vand.u32 4294901760, %v2776_v50 }
 0x166   :  { %1810 = vmatpush3.msra.mxu1 %v1978_v47  ;;  %1228 = vmatmul.mubr.f32.vlgmr.msra.gmra.mxu0 %v2407_v2  ;;  %v2785_v47 = vand.u32 4294901760, %v1963_v41  ;;  %v2789_v41 = vand.u32 4294901760, %v2028_v7  ;;  %v2795_v7 = vand.u32 4294901760, %v2751_v44  ;;  %v2807_v2 = vand.u32 4294901760, %v2774_v54 }
 0x167   :  { %1768 = vmatprep.subr.mxu0 %v2781_v29  ;;  %1811 = vmatprep.subr.mxu1 %v2010_v62  ;;  %v2793_v62 = vand.u32 4294901760, %v2747_v22  ;;  %v2811_v22 = vand.u32 4294901760, %v2778_v48 }
 0x168   :  { %1769 = vmatpush3.msra.mxu0 %v2782_v33  ;;  %1502 = vmatprep.mubr.f32.mxu0 %v2410_v9  ;;  %v2808_v9 = vand.u32 4294901760, %v2775_v21 }
 0x169   :  { %1812 = vmatpush3.msra.mxu1 %v2019_v3  ;;  %1770 = vmatprep.subr.mxu0 %v2783_v37  ;;  %v2794_v3 = vand.u32 4294901760, %v2749_v59 }
 0x16a   :  { %1813 = vmatprep.subr.mxu1 %v2030_v8  ;;  %1771 = vmatpush3.msra.mxu0 %v2784_v42  ;;  %v2796_v8 = vand.u32 4294901760, %v2753_v58 }
 0x16b   :  { %1814 = vmatpush3.msra.mxu1 %v2042_v13  ;;  %1772 = vmatprep.subr.mxu0 %v2785_v47  ;;  %v2798_v13 = vand.u32 4294901760, %v2757_v31 }
 0x16c   :  { %1815 = vmatprep.subr.mxu1 %v2052_v18  ;;  %1773 = vmatpush3.msra.mxu0 %v2786_v28  ;;  %v2800_v18 = vand.u32 4294901760, %v2761_v19 }
 0x16d   :  { %1816 = vmatpush3.msra.mxu1 %v2062_v27  ;;  %1774 = vmatprep.subr.mxu0 %v2787_v32  ;;  %v2801_v27 = vand.u32 4294901760, %v2763_v61 }
 0x16e   :  { %1817 = vmatprep.subr.mxu1 %v2072_v39  ;;  %1775 = vmatpush3.msra.mxu0 %v2788_v36  ;;  %v2802_v39 = vand.u32 4294901760, %v2765_v11 }
 0x16f   :  { %1818 = vmatpush3.msra.mxu1 %v2082_v49  ;;  %1776 = vmatprep.subr.mxu0 %v2789_v41  ;;  %v2803_v49 = vand.u32 4294901760, %v2767_v25 }
 0x170   :  { %1819 = vmatprep.subr.mxu1 %v2114_v10  ;;  %1777 = vmatpush3.msra.mxu0 %v2790_v46  ;;  %v2804_v10 = vand.u32 4294901760, %v2769_v51 }
 0x171   :  { %1820 = vmatpush3.msra.mxu1 %v2123_v20  ;;  %1778 = vmatprep.subr.mxu0 %v2791_v52  ;;  %v2805_v20 = vand.u32 4294901760, %v2771_v5 }
 0x172   :  { %1821 = vmatprep.subr.mxu1 %v2134_v60  ;;  %1779 = vmatpush3.msra.mxu0 %v2792_v57  ;;  %v2806_v60 = vand.u32 4294901760, %v2773_v35 }
 0x173   :  { %1822 = vmatpush3.msra.mxu1 %v2746_v53  ;;  %1780 = vmatprep.subr.mxu0 %v2793_v62  ;;  %v2810_v53 = vand.u32 4294901760, %v2777_v55 }
 0x174   :  { %1823 = vmatprep.subr.mxu1 %v2748_v1  ;;  %1781 = vmatpush3.msra.mxu0 %v2794_v3  ;;  %v2812_v1 = vand.u32 4294901760, %v2779_v23 }
 0x175   :  { %1824 = vmatpush3.msra.mxu1 %v2750_v14  ;;  %1782 = vmatprep.subr.mxu0 %v2795_v7 }
 0x176   :  { %1825 = vmatprep.subr.mxu1 %v2752_v24  ;;  %1783 = vmatpush3.msra.mxu0 %v2796_v8 }
 0x177   :  { %1826 = vmatpush3.msra.mxu1 %v2754_v38  ;;  %1784 = vmatprep.subr.mxu0 %v2797_v12 }
 0x178   :  { %1827 = vmatprep.subr.mxu1 %v2756_v34  ;;  %1785 = vmatpush3.msra.mxu0 %v2798_v13 }
 0x179   :  { %1828 = vmatpush3.msra.mxu1 %v2758_v0  ;;  %1786 = vmatprep.subr.mxu0 %v2799_v17 }
 0x17a   :  { %1829 = vmatprep.subr.mxu1 %v2760_v45  ;;  %1787 = vmatpush3.msra.mxu0 %v2800_v18 }
 0x17b   :  { %1830 = vmatpush3.msra.mxu1 %v2762_v30  ;;  %1788 = vmatprep.subr.mxu0 %v2801_v27 }
 0x17c   :  { %1831 = vmatprep.subr.mxu1 %v2764_v16  ;;  %1789 = vmatpush3.msra.mxu0 %v2802_v39 }
 0x17d   :  { %1832 = vmatpush3.msra.mxu1 %v2766_v4  ;;  %1790 = vmatprep.subr.mxu0 %v2803_v49 }
 0x17e   :  { %1833 = vmatprep.subr.mxu1 %v2768_v63  ;;  %1791 = vmatpush3.msra.mxu0 %v2804_v10 }
 0x17f   :  { %1834 = vmatpush3.msra.mxu1 %v2770_v43  ;;  %1792 = vmatprep.subr.mxu0 %v2805_v20 }
 0x180   :  { %1608 = vmatmul.mubr.f32.vlgmr.msra.gmra.mxu1 %v2404_v6  ;;  %1793 = vmatpush3.msra.mxu0 %v2806_v60 }
 0x181   :  { %1794 = vmatprep.subr.mxu0 %v2807_v2 }
 0x182   :  { %1795 = vmatpush3.msra.mxu0 %v2808_v9 }
 0x183   :  { %1796 = vmatprep.subr.mxu0 %v2809_v40 }
 0x184   :  { %1797 = vmatpush3.msra.mxu0 %v2810_v53 }
 0x185   :  { %1798 = vmatprep.subr.mxu0 %v2811_v22 }
 0x186   :  { %1799 = vmatpush3.msra.mxu0 %v2812_v1 }
 0x187   :  { %1504 = vmatmul.mubr.f32.vlgmr.msra.gmra.mxu0 %v2404_v6 }
 0x1fd   :  { %v1695_v14 = vpop.f32.mrf.mxu1 }
 0x1ff   :  { %v1696_v38 = vpop.f32.mrf.mxu1 }
 0x200   :  { %v1697_v56 = vadd.f32 %v1696_v38, %v1695_v14 }
 0x205   :  { %v1660_v59 = vpop.f32.mrf.mxu0 }
 0x207   :  { %v1661_v44 = vpop.f32.mrf.mxu0 }
 0x208   :  { %v1662_v58 = vadd.f32 %v1661_v44, %v1660_v59 }
 0x20a   :  { %v860_v0 = vadd.f32 %v1662_v58, %v1627_v15 }
 0x20c   :  { %v1092_v30 = vadd.f32 %v1697_v56, %v860_v0 }
 0x21e   :  { %v1765_v34 = vpop.f32.mrf.mxu1 }
 0x220   :  { %v1766_v19 = vpop.f32.mrf.mxu1 }
 0x221   :  { %v1767_v11 = vadd.f32 %v1766_v19, %v1765_v34 }
 0x226   :  { %v1730_v24 = vpop.f32.mrf.mxu0 }
 0x228   :  { %v1731_v31 = vpop.f32.mrf.mxu0 }
 0x229   :  { %v1732_v45 = vadd.f32 %v1731_v31, %v1730_v24 }
 0x22b   :  { %v1230_v16 = vadd.f32 %v1732_v45, %v1092_v30 }
 0x22d   :  { %v1338_v63 = vadd.f32 %v1767_v11, %v1230_v16 }
 0x240   :  { %v1835_v61 = vpop.f32.mrf.mxu1 }
 0x242   :  { %v1836_v4 = vpop.f32.mrf.mxu1 }
 0x243   :  { %v1837_v43 = vadd.f32 %v1836_v4, %v1835_v61 }
 0x247   :  { %v1800_v6 = vpop.f32.mrf.mxu0 }
 0x249   :  { %v1801_v25 = vpop.f32.mrf.mxu0 }
 0x24a   :  { %v1802_v51 = vadd.f32 %v1801_v25, %v1800_v6 }
 0x24c   :  { %v1506_v5 = vadd.f32 %v1802_v51, %v1338_v63 }
 0x24e   :  { %v1610_v35 = vadd.f32 %v1837_v43, %v1506_v5 }
 0x250   :  { %v1613_v54 = vmax.f32 %v1610_v35, 0.0 }
 0x252   :  { %1614 = vst [vmem:[%s2595_s5] sm:$0xff] %v1613_v54 }

</bundles_post_ra>
